<compile_context>
chip_gen: v5e
topology: v5e:2x2
jax: 0.10.0
libtpu: 0.0.40
codegen_flags: <defaults>
</compile_context>

<pallas_src>
import functools

import numpy as np
import jax
import jax.numpy as jnp
from jax.experimental import pallas as pl
from jax.experimental.pallas import tpu as pltpu

MUL = 8                      # multiplicity of every irrep block
L1_DIM = 3                   # dim of an l=1 irrep
D_SCAL = MUL                 # 8
D_VEC = MUL * L1_DIM         # 24
D_IN = D_SCAL + D_VEC        # 32
D_OUT = D_SCAL + D_VEC       # 32
D_PRE = D_SCAL + 2 * D_VEC   # 56 rows of the folded pre matrix: [s | g_exp | v]
NEG_SLOPE = 0.01             # torch.nn.LeakyReLU default

# Packed weight-slab row layout (feature-major / transposed, 32 cols):
#   rows [  0: 56)  WpreT (56,32): rows  0: 8 = Ws^T           in cols 0:8
#                                  rows  8:32 = (Wg @ Et^T)^T  in cols 0:8   (Et folded in)
#                                  rows 32:56 = Wv_exp^T       in cols 8:32
#   rows [ 56: 88)  UsT_pad (32, 8) in cols 0:8  : [[Us^T], [0]]
#   rows [ 88:120)  UvT_pad (32,24) in cols 0:24 : [[0], [Uv_exp^T]]
ROW_PRE0, ROW_PRE1 = 0, D_PRE          # 0..56
ROW_US0, ROW_US1 = D_PRE, D_PRE + 32   # 56..88
ROW_UV0, ROW_UV1 = ROW_US1, ROW_US1 + 32  # 88..120
W_ROWS = ROW_UV1               # 120


def _normalize2mom_consts():
    """e3nn normalize2mom factors: 1/sqrt(E[act(z)^2]), z ~ N(0,1).

    e3nn uses a 1e6-sample Monte-Carlo; here deterministic trapezoid quadrature
    (agrees to ~MC noise level). np.trapz was removed in numpy 2.x, so in-script.
    """
    z = np.linspace(-10.0, 10.0, 200001)
    pdf = np.exp(-0.5 * z * z) / np.sqrt(2.0 * np.pi)
    lrelu = np.where(z >= 0.0, z, NEG_SLOPE * z)
    sig = 1.0 / (1.0 + np.exp(-z))

    def trapezoid(y):
        return float(np.sum(0.5 * (y[1:] + y[:-1]) * np.diff(z)))

    c_lrelu = 1.0 / np.sqrt(trapezoid(lrelu ** 2 * pdf))
    c_sig = 1.0 / np.sqrt(trapezoid(sig ** 2 * pdf))
    return float(c_lrelu), float(c_sig)


def make_params(key):
    """Deterministic synthetic e3nn.o3.Linear weights (N(0,1), 1/sqrt(fan_in) folded in).

    Returns (weight_slab, raw_params):
      weight_slab : (120, 32) f32 packed/transposed weights for the Pallas kernel.
      raw_params  : per-block matrices for the pure-JAX reference.
    """
    ks = jax.random.split(key, 5)
    scale = 1.0 / np.sqrt(MUL)  # path_normalization='element', fan_in = 8 for every path
    Ws = jax.random.normal(ks[0], (MUL, MUL), jnp.float32) * scale  # pre:  0e -> 0e scalars
    Wg = jax.random.normal(ks[1], (MUL, MUL), jnp.float32) * scale  # pre:  0e -> 0e gates
    Wv = jax.random.normal(ks[2], (MUL, MUL), jnp.float32) * scale  # pre:  1o -> 1o gated
    Us = jax.random.normal(ks[3], (MUL, MUL), jnp.float32) * scale  # post: 0e -> 0e
    Uv = jax.random.normal(ks[4], (MUL, MUL), jnp.float32) * scale  # post: 1o -> 1o

    eye3 = jnp.eye(L1_DIM, dtype=jnp.float32)
    Wv_exp = jnp.kron(Wv, eye3)   # (24, 24): equivariant 1o linear acts per component
    Uv_exp = jnp.kron(Uv, eye3)   # (24, 24)
    # Gate-broadcast: each per-multiplicity gate scalar copied over the 3 vector components.
    Et = jnp.kron(jnp.eye(MUL, dtype=jnp.float32), jnp.ones((L1_DIM, 1), jnp.float32))  # (24, 8)

    slab = jnp.zeros((W_ROWS, D_IN), jnp.float32)
    # pre (transposed, Et folded into the gate rows: (Wg @ Et^T)^T = Et @ Wg^T)
    slab = slab.at[0:D_SCAL, 0:D_SCAL].set(Ws.T)
    slab = slab.at[D_SCAL:D_SCAL + D_VEC, 0:D_SCAL].set(Et @ Wg.T)
    slab = slab.at[D_SCAL + D_VEC:D_PRE, D_SCAL:D_IN].set(Wv_exp.T)
    # post, split by linearity into the s-column and v-column blocks
    slab = slab.at[ROW_US0:ROW_US0 + D_SCAL, 0:D_SCAL].set(Us.T)        # rows 56:64
    slab = slab.at[ROW_UV0 + D_SCAL:ROW_UV1, 0:D_VEC].set(Uv_exp.T)     # rows 96:120

    raw = (Ws, Wg, Wv_exp, Us, Uv_exp, Et)
    return slab, raw


def gate_wrapper_kernel(x_ref, w_ref, o_ref, *, c_lrelu, c_sig):
    # x_ref/o_ref: (tn, 32) row-major blocks (module layout). The relayout to the
    # lane-dense (32, tn) feature-major form happens here on the XLU, which has
    # slack in this HBM-bound kernel -- no host-side transposes/pads.
    xt = jnp.transpose(x_ref[...])                       # (32, tn) lane-dense
    w = w_ref[...]                                       # (120, 32) packed weight slab

    wpre_t = w[ROW_PRE0:ROW_PRE1, :]                     # (56, 32)
    us_t = w[ROW_US0:ROW_US1, 0:D_SCAL]                  # (32, 8)  = [[Us^T], [0]]
    uv_t = w[ROW_UV0:ROW_UV1, 0:D_VEC]                   # (32, 24) = [[0], [Uv_exp^T]]

    # --- pre_gate: single block-diagonal matmul (Et gate-broadcast already folded in) ---
    a = jnp.dot(wpre_t, xt, preferred_element_type=jnp.float32)        # (56, tn)
    s = a[0:D_SCAL, :]                                                   # scalars   (8, tn)
    g = a[D_SCAL:D_SCAL + D_VEC, :]                                      # raw gates (24, tn)
    v = a[D_SCAL + D_VEC:D_PRE, :]                                       # gated 1o  (24, tn)

    # --- gate: normalized LeakyReLU on scalars, normalized Sigmoid gating on 1o ---
    s = c_lrelu * jnp.where(s >= 0, s, NEG_SLOPE * s)
    v = v * (c_sig * jax.nn.sigmoid(g))

    # --- post_gate: block-diagonal matmul split by linearity (no concat copy) ---
    out_t = (jnp.dot(us_t, s, preferred_element_type=jnp.float32)
             + jnp.dot(uv_t, v, preferred_element_type=jnp.float32))     # (32, tn)

    o_ref[...] = jnp.transpose(out_t).astype(o_ref.dtype)                # (tn, 32)


def _round_up(a, b):
    return ((a + b - 1) // b) * b


def gate_wrapper(x, weight_slab, c_lrelu, c_sig, *, tn=8192):
    """x: (N, 32) -> (N, 32). Row-major blocks in/out; lane-dense compute in-kernel."""
    N, D = x.shape
    assert D == D_IN
    # Batch tile: multiple of 128; large to amortize the ~0.35us/step overhead, but
    # capped so the grid has >= 2 steps whenever N allows (v7x megacore split).
    tn_eff = max(128, min(int(tn), _round_up((N + 1) // 2, 128)))
    grid = pl.cdiv(N, tn_eff)   # no host padding; Pallas masks the partial edge block

    kernel = functools.partial(gate_wrapper_kernel, c_lrelu=c_lrelu, c_sig=c_sig)
    return pl.pallas_call(
        kernel,
        out_shape=jax.ShapeDtypeStruct((N, D_OUT), x.dtype),
        grid_spec=pltpu.PrefetchScalarGridSpec(
            num_scalar_prefetch=0,
            grid=(grid,),
            in_specs=[
                pl.BlockSpec((tn_eff, D_IN), lambda i: (i, 0)),     # streaming input tile
                pl.BlockSpec((W_ROWS, D_IN), lambda i: (0, 0)),     # single packed weight slab
            ],
            out_specs=pl.BlockSpec((tn_eff, D_OUT), lambda i: (i, 0)),
        ),
        compiler_params=pltpu.CompilerParams(
            dimension_semantics=("parallel",),
            vmem_limit_bytes=64 * 1024 * 1024,
        ),
    )(x, weight_slab)


def reference(x, raw_params, c_lrelu, c_sig):
    """Pure-JAX reference of the same forward (row-major layout, un-folded weights)."""
    Ws, Wg, Wv_exp, Us, Uv_exp, Et = raw_params
    x0, xv = x[:, :D_SCAL], x[:, D_SCAL:]
    s = x0 @ Ws
    g = x0 @ Wg
    v = xv @ Wv_exp
    s = c_lrelu * jnp.where(s >= 0, s, NEG_SLOPE * s)
    g = c_sig * jax.nn.sigmoid(g)
    v = v * (g @ Et.T)
    return jnp.concatenate([s @ Us, v @ Uv_exp], axis=-1)


if __name__ == "__main__":
    key = jax.random.PRNGKey(0)
    kx, kp = jax.random.split(key)
    weight_slab, raw_params = make_params(kp)
    c_lrelu, c_sig = _normalize2mom_consts()

    # Cases: (64, default)  -> single partial tile, grid=1
    #        (300, default) -> tn_eff=256, grid=2, non-128-multiple tail (masked edge block)
    #        (300, 128)     -> grid=3, multi-tile index_map exercised
    for batch, tn in ((64, 8192), (300, 8192), (300, 128)):
        x = jax.random.normal(kx, (batch, D_IN), jnp.float32)
        out = jax.block_until_ready(gate_wrapper(x, weight_slab, c_lrelu, c_sig, tn=tn))
        ref = jax.block_until_ready(reference(x, raw_params, c_lrelu, c_sig))
        np.testing.assert_allclose(np.asarray(out), np.asarray(ref), rtol=1e-5, atol=1e-5)
    print("KERNEL_OK")
</pallas_src>

<mosaic_0001>
module attributes {stable_mosaic.version = 11 : i64} {
  func.func @gate_wrapper_kernel(%arg0: i32, %arg1: memref<128x32xf32, #tpu.memory_space<vmem>>, %arg2: memref<120x32xf32, #tpu.memory_space<vmem>>, %arg3: memref<128x32xf32, #tpu.memory_space<vmem>>) attributes {dimension_semantics = [#tpu.dimension_semantics<parallel>], iteration_bounds = array<i64: 1>, scalar_prefetch = 0 : i64, scratch_operands = 0 : i64, tpu.core_type = #tpu.core_type<tc>, window_params = [{transform_indices = @transform_0, window_bounds = array<i64: 128, 32>}, {pipeline_mode = #tpu.pipeline_mode<synchronous>, transform_indices = @transform_1, window_bounds = array<i64: 120, 32>}, {transform_indices = @transform_2, window_bounds = array<i64: 128, 32>}]} {
    %c0 = arith.constant 0 : index
    %c0_0 = arith.constant 0 : index
    %0 = vector.load %arg1[%c0, %c0_0] : memref<128x32xf32, #tpu.memory_space<vmem>>, vector<128x32xf32>
    %1 = tpu.transpose %0, [1, 0] : vector<128x32xf32> -> vector<32x128xf32>
    %c0_1 = arith.constant 0 : index
    %c0_2 = arith.constant 0 : index
    %2 = vector.load %arg2[%c0_1, %c0_2] : memref<120x32xf32, #tpu.memory_space<vmem>>, vector<120x32xf32>
    %3 = vector.extract_strided_slice %2 {offsets = [0, 0], sizes = [56, 32], strides = [1, 1]} : vector<120x32xf32> to vector<56x32xf32>
    %4 = vector.extract_strided_slice %2 {offsets = [56, 0], sizes = [32, 8], strides = [1, 1]} : vector<120x32xf32> to vector<32x8xf32>
    %5 = vector.extract_strided_slice %2 {offsets = [88, 0], sizes = [32, 24], strides = [1, 1]} : vector<120x32xf32> to vector<32x24xf32>
    %cst = arith.constant dense<0.000000e+00> : vector<56x128xf32>
    %6 = tpu.matmul %3, %1, %cst {dimension_numbers = #tpu.dot_dimension_numbers<[1], [0], [0], [1], [0, 0, 1, 1], [], []>} : vector<56x32xf32>, vector<32x128xf32>, vector<56x128xf32> -> vector<56x128xf32>
    %7 = vector.extract_strided_slice %6 {offsets = [0, 0], sizes = [8, 128], strides = [1, 1]} : vector<56x128xf32> to vector<8x128xf32>
    %8 = vector.extract_strided_slice %6 {offsets = [8, 0], sizes = [24, 128], strides = [1, 1]} : vector<56x128xf32> to vector<24x128xf32>
    %9 = vector.extract_strided_slice %6 {offsets = [32, 0], sizes = [24, 128], strides = [1, 1]} : vector<56x128xf32> to vector<24x128xf32>
    %cst_3 = arith.constant 0.000000e+00 : f32
    %10 = vector.broadcast %cst_3 : f32 to vector<8x128xf32>
    %11 = arith.cmpf oge, %7, %10 : vector<8x128xf32>
    %cst_4 = arith.constant 0.00999999977 : f32
    %12 = vector.broadcast %cst_4 : f32 to vector<8x128xf32>
    %13 = arith.mulf %12, %7 : vector<8x128xf32>
    %14 = arith.select %11, %7, %13 : vector<8x128xi1>, vector<8x128xf32>
    %cst_5 = arith.constant 1.41414285 : f32
    %15 = vector.broadcast %cst_5 : f32 to vector<8x128xf32>
    %16 = arith.mulf %15, %14 : vector<8x128xf32>
    %17 = arith.negf %8 : vector<24x128xf32>
    %18 = math.exp %17 : vector<24x128xf32>
    %cst_6 = arith.constant 1.000000e+00 : f32
    %19 = vector.broadcast %cst_6 : f32 to vector<24x128xf32>
    %20 = arith.addf %19, %18 : vector<24x128xf32>
    %21 = arith.divf %19, %20 : vector<24x128xf32>
    %cst_7 = arith.constant 1.8462286 : f32
    %22 = vector.broadcast %cst_7 : f32 to vector<24x128xf32>
    %23 = arith.mulf %22, %21 : vector<24x128xf32>
    %24 = arith.mulf %9, %23 : vector<24x128xf32>
    %cst_8 = arith.constant dense<0.000000e+00> : vector<32x128xf32>
    %25 = tpu.matmul %4, %16, %cst_8 {dimension_numbers = #tpu.dot_dimension_numbers<[1], [0], [0], [1], [0, 0, 1, 1], [], []>} : vector<32x8xf32>, vector<8x128xf32>, vector<32x128xf32> -> vector<32x128xf32>
    %cst_9 = arith.constant dense<0.000000e+00> : vector<32x128xf32>
    %26 = tpu.matmul %5, %24, %cst_9 {dimension_numbers = #tpu.dot_dimension_numbers<[1], [0], [0], [1], [0, 0, 1, 1], [], []>} : vector<32x24xf32>, vector<24x128xf32>, vector<32x128xf32> -> vector<32x128xf32>
    %27 = arith.addf %25, %26 : vector<32x128xf32>
    %28 = tpu.transpose %27, [1, 0] : vector<32x128xf32> -> vector<128x32xf32>
    %c0_10 = arith.constant 0 : index
    %c0_11 = arith.constant 0 : index
    %29 = vector.load %arg3[%c0_10, %c0_11] : memref<128x32xf32, #tpu.memory_space<vmem>>, vector<128x32xf32>
    tpu.vector_store %arg3[%c0_10, %c0_11], %28 {strides = array<i32>} : memref<128x32xf32, #tpu.memory_space<vmem>>, vector<128x32xf32>,
    return
  }
  func.func @transform_0(%arg0: i32) -> (i32, i32) {
    %c0_i32 = arith.constant 0 : i32
    %c0_i32_0 = arith.constant 0 : i32
    return %arg0, %c0_i32 : i32, i32
  }
  func.func @transform_1(%arg0: i32) -> (i32, i32) {
    %c0_i32 = arith.constant 0 : i32
    %c0_i32_0 = arith.constant 0 : i32
    %c0_i32_1 = arith.constant 0 : i32
    return %c0_i32, %c0_i32_0 : i32, i32
  }
  func.func @transform_2(%arg0: i32) -> (i32, i32) {
    %c0_i32 = arith.constant 0 : i32
    %c0_i32_0 = arith.constant 0 : i32
    return %arg0, %c0_i32 : i32, i32
  }
}

</mosaic_0001>

<bundles_post_ra>
// kernel: tpu_custom_call.1
= control target key start
LH: loop header
LB: loop body
LE: loop exit
PB: predicated region body
PF: predicated region fallthrough
CT: control target
= control target key end

     0   :  { %vm42_vm0 = vcmask 261120   ;;  %vm259_vm2 = vcmask 64512   ;;  %vm217_vm15 = vcmask 195584   ;;  %s671_s0 = inlined_call_operand.vmem [shape: f32[64,32], index: 0, kind: input, shape index: {}]   ;;  %s672_s1 = inlined_call_operand.vmem [shape: f32[120,32], index: 1, kind: input, shape index: {}]   ;;  %s673_s2 = inlined_call_operand.vmem [shape: f32[64,32], index: 2, kind: output, shape index: {}]  }
   0x1   :  { %v26_v0 = vld [vmem:[%s671_s0 + $0x78] sm:$0xff]  ;;  %v25_v1 = vld [vmem:[%s671_s0 + $0x70] sm:$0xff]  ;;  %v24_v2 = vld [vmem:[%s671_s0 + $0x68] sm:$0xff] }
   0x2   :  { %452 = vmatpush.xpose.msk.msra.mxu3 %vm42_vm0, %v26_v0  ;;  %418 = vmatpush.xpose.msk.msra.mxu0 %vm42_vm0, %v26_v0  ;;  %v23_v3 = vld [vmem:[%s671_s0 + $0x60] sm:$0xff]  ;;  %v22_v4 = vld [vmem:[%s671_s0 + $0x58] sm:$0xff]  ;;  %v21_v5 = vld [vmem:[%s671_s0 + $0x50] sm:$0xff] }
   0x3   :  { %v20_v6 = vld [vmem:[%s671_s0 + $0x48] sm:$0xff]  ;;  %v19_v7 = vld [vmem:[%s671_s0 + $0x40] sm:$0xff]  ;;  %v18_v8 = vld [vmem:[%s671_s0 + $0x38] sm:$0xff] }
   0x4   :  { %v17_v9 = vld [vmem:[%s671_s0 + $0x30] sm:$0xff]  ;;  %v16_v10 = vld [vmem:[%s671_s0 + $0x28] sm:$0xff]  ;;  %v15_v11 = vld [vmem:[%s671_s0 + $0x20] sm:$0xff] }
   0x5   :  { %v14_v12 = vld [vmem:[%s671_s0 + $0x18] sm:$0xff]  ;;  %v13_v13 = vld [vmem:[%s671_s0 + $0x10] sm:$0xff]  ;;  %v12_v14 = vld [vmem:[%s671_s0 + $0x8] sm:$0xff] }
   0x6   :  { %453 = vmatpush.xpose.msk.msra.mxu3 %vm42_vm0, %v25_v1  ;;  %419 = vmatpush.xpose.msk.msra.mxu0 %vm42_vm0, %v25_v1  ;;  %v11_v15 = vld [vmem:[%s671_s0] sm:$0xff]  ;;  %v28_v16 = vld [vmem:[%s672_s1 + $0x8] sm:$0xff]  ;;  %v29_v18 = vld [vmem:[%s672_s1 + $0x10] sm:$0xff] }
   0x7   :  { %v27_v17 = vld [vmem:[%s672_s1] sm:$0xff]  ;;  %v30_v19 = vld [vmem:[%s672_s1 + $0x18] sm:$0xff]  ;;  %v32_v21 = vld [vmem:[%s672_s1 + $0x28] sm:$0xff] }
   0x8   :  { %v31_v20 = vld [vmem:[%s672_s1 + $0x20] sm:$0xff]  ;;  %v33_v22 = vld [vmem:[%s672_s1 + $0x30] sm:$0xff]  ;;  %v34_v32 = vld [vmem:[%s672_s1 + $0x38] sm:$0xff] }
   0x9   :  { %v35_v39 = vld [vmem:[%s672_s1 + $0x40] sm:$0xff]  ;;  %v36_v48 = vld [vmem:[%s672_s1 + $0x48] sm:$0xff]  ;;  %v37_v63 = vld [vmem:[%s672_s1 + $0x50] sm:$0xff] }
   0xa   :  { %454 = vmatpush.xpose.msk.msra.mxu3 %vm42_vm0, %v24_v2  ;;  %420 = vmatpush.xpose.msk.msra.mxu0 %vm42_vm0, %v24_v2 }
   0xe   :  { %455 = vmatpush.xpose.msk.msra.mxu3 %vm42_vm0, %v23_v3  ;;  %421 = vmatpush.xpose.msk.msra.mxu0 %vm42_vm0, %v23_v3 }
  0x12   :  { %456 = vmatpush.xpose.msk.msra.mxu3 %vm42_vm0, %v22_v4  ;;  %422 = vmatpush.xpose.msk.msra.mxu0 %vm42_vm0, %v22_v4 }
  0x16   :  { %457 = vmatpush.xpose.msk.msra.mxu3 %vm42_vm0, %v21_v5  ;;  %423 = vmatpush.xpose.msk.msra.mxu0 %vm42_vm0, %v21_v5 }
  0x1a   :  { %458 = vmatpush.xpose.msk.msra.mxu3 %vm42_vm0, %v20_v6  ;;  %424 = vmatpush.xpose.msk.msra.mxu0 %vm42_vm0, %v20_v6 }
  0x1e   :  { %459 = vmatpush.xpose.msk.msra.mxu3 %vm42_vm0, %v19_v7  ;;  %425 = vmatpush.xpose.msk.msra.mxu0 %vm42_vm0, %v19_v7 }
  0x22   :  { %460 = vmatpush.xpose.msk.msra.mxu3 %vm42_vm0, %v18_v8  ;;  %426 = vmatpush.xpose.msk.msra.mxu0 %vm42_vm0, %v18_v8 }
  0x26   :  { %461 = vmatpush.xpose.msk.msra.mxu3 %vm42_vm0, %v17_v9  ;;  %427 = vmatpush.xpose.msk.msra.mxu0 %vm42_vm0, %v17_v9 }
  0x2a   :  { %462 = vmatpush.xpose.msk.msra.mxu3 %vm42_vm0, %v16_v10  ;;  %428 = vmatpush.xpose.msk.msra.mxu0 %vm42_vm0, %v16_v10 }
  0x2e   :  { %463 = vmatpush.xpose.msk.msra.mxu3 %vm42_vm0, %v15_v11  ;;  %429 = vmatpush.xpose.msk.msra.mxu0 %vm42_vm0, %v15_v11 }
  0x32   :  { %464 = vmatpush.xpose.msk.msra.mxu3 %vm42_vm0, %v14_v12  ;;  %430 = vmatpush.xpose.msk.msra.mxu0 %vm42_vm0, %v14_v12 }
  0x36   :  { %465 = vmatpush.xpose.msk.msra.mxu3 %vm42_vm0, %v13_v13  ;;  %431 = vmatpush.xpose.msk.msra.mxu0 %vm42_vm0, %v13_v13 }
  0x3a   :  { %466 = vmatpush.xpose.msk.msra.mxu3 %vm42_vm0, %v12_v14  ;;  %432 = vmatpush.xpose.msk.msra.mxu0 %vm42_vm0, %v12_v14 }
  0x3e   :  { %467 = vmatpush.xpose.msk.msra.mxu3 %vm42_vm0, %v11_v15  ;;  %433 = vmatpush.xpose.msk.msra.mxu0 %vm42_vm0, %v11_v15 }
  0x41   :  { %435 = vmatmul.msk.f32.vlgmr.msra.gmra.mxu3 %vm42_vm0, %v28_v16  ;;  %434 = vmatmul.msk.f32.vlgmr.msra.gmra.mxu0 %vm42_vm0, %v27_v17 }
  0x49   :  { %436 = vmatmul.msk.f32.gmra.mxu3 %vm42_vm0, %v29_v18 }
  0x51   :  { %437 = vmatmul.msk.f32.gmra.mxu3 %vm42_vm0, %v30_v19  ;;  %v38_v19 = vld [vmem:[%s672_s1 + $0x58] sm:$0xff] }
  0x59   :  { %438 = vmatmul.msk.f32.gmra.mxu3 %vm42_vm0, %v31_v20  ;;  %v39_v20 = vld [vmem:[%s672_s1 + $0x60] sm:$0xff] }
  0x61   :  { %439 = vmatmul.msk.f32.gmra.mxu3 %vm42_vm0, %v32_v21  ;;  %v40_v21 = vld [vmem:[%s672_s1 + $0x68] sm:$0xff] }
  0x69   :  { %440 = vmatmul.msk.f32.gmra.mxu3 %vm42_vm0, %v33_v22  ;;  %v41_v22 = vld [vmem:[%s672_s1 + $0x70] sm:$0xff] }
  0xbe   :  { %v129_v25 = vpop.f32.mrf.mxu0 }
  0xbf   :  { %vm150_vm1 = vcmp.ge.f32.partialorder %v129_v25, 0.0  ;;  %v151_v27 = vmul.f32 0.01, %v129_v25 }
  0xc1   :  { %v152_v30 = vsel %vm150_vm1, %v129_v25, %v151_v27 }
  0xc2   :  { %v153_v31 = vmul.f32 1.4141428, %v152_v30 }
  0xc4   :  { %v132_v23 = vpop.f32.mrf.mxu3  ;;  %287 = vmatpush.msra.mxu2 %v153_v31 }
  0xc5   :  { %v441_v24 = vmul.f32 -1.442695, %v132_v23  ;;  %448 = vmatmul.msk.f32.vlgmr.msra.gmra.mxu2 %vm259_vm2, %v34_v32 }
  0xc7   :  { %469 = vpow2.f32 %v441_v24 }
  0xcc   :  { %v135_v26 = vpop.f32.mrf.mxu3 }
  0xcd   :  { %v470_v28 = vpop.eup %469  ;;  %v442_v29 = vmul.f32 -1.442695, %v135_v26  ;;  %449 = vmatmul.msk.f32.gmra.mxu2 %vm259_vm2, %v35_v39 }
  0xce   :  { %v163_v33 = vadd.f32 1.0, %v470_v28 }
  0xcf   :  { %471 = vpow2.f32 %v442_v29 }
  0xd0   :  { %473 = vrcp.f32 %v163_v33  ;;  %vm171_vm6 = vweird.f32 %v163_v33  ;;  %v175_v59 = vand.u32 2147483647, %v163_v33  ;;  %v177_v60 = vand.u32 2147483648, %v163_v33 }
  0xd2   :  { %v178_v6 = vor.u32 1.1754944e-38, %v177_v60  ;;  %vm176_vm13 = vcmp.eq.f32.partialorder %v175_v59, 8.507059e+37 }
  0xd4   :  { %v138_v34 = vpop.f32.mrf.mxu3 }
  0xd5   :  { %v472_v35 = vpop.eup %471  ;;  %v443_v36 = vmul.f32 -1.442695, %v138_v34  ;;  %450 = vmatmul.msk.f32.gmra.mxu2 %vm259_vm2, %v36_v48 }
  0xd6   :  { %v164_v37 = vadd.f32 1.0, %v472_v35  ;;  %v474_v38 = vpop.eup %473 }
  0xd7   :  { %475 = vpow2.f32 %v443_v36  ;;  %v167_v42 = vmul.f32 %v474_v38, %v163_v33  ;;  %vm172_vm4 = vweird.f32 %v474_v38 }
  0xd8   :  { %477 = vrcp.f32 %v164_v37  ;;  %v192_v55 = vand.u32 2147483648, %v164_v37  ;;  %vm186_vm5 = vweird.f32 %v164_v37  ;;  %v190_v57 = vand.u32 2147483647, %v164_v37  ;;  %vm173_vm9 = vmor %vm171_vm6, %vm172_vm4 }
  0xd9   :  { %v168_v46 = vsub.f32 1.0, %v167_v42 }
  0xda   :  { %v193_v3 = vor.u32 1.1754944e-38, %v192_v55  ;;  %vm191_vm10 = vcmp.eq.f32.partialorder %v190_v57, 8.507059e+37 }
  0xdb   :  { %v169_v50 = vmul.f32 %v474_v38, %v168_v46 }
  0xdc   :  { %v141_v40 = vpop.f32.mrf.mxu3 }
  0xdd   :  { %v476_v41 = vpop.eup %475  ;;  %v170_v56 = vadd.f32 %v474_v38, %v169_v50  ;;  %451 = vmatmul.msk.f32.gmra.mxu2 %vm259_vm2, %v37_v63 }
  0xde   :  { %v478_v43 = vpop.eup %477  ;;  %v165_v44 = vadd.f32 1.0, %v476_v41 }
  0xdf   :  { %v182_v45 = vmul.f32 %v478_v43, %v164_v37  ;;  %vm187_vm3 = vweird.f32 %v478_v43  ;;  %v174_v4 = vsel %vm173_vm9, %v474_v38, %v170_v56 }
  0xe0   :  { %479 = vrcp.f32 %v165_v44  ;;  %vm616_vm7 = vmor %vm186_vm5, %vm187_vm3  ;;  %v207_v62 = vand.u32 2147483648, %v165_v44  ;;  %v205_v2 = vand.u32 2147483647, %v165_v44  ;;  %vm201_vm11 = vweird.f32 %v165_v44 }
  0xe1   :  { %v183_v47 = vsub.f32 1.0, %v182_v45  ;;  %v179_v10 = vsel %vm176_vm13, %v178_v6, %v174_v4 }
  0xe2   :  { %v208_v8 = vor.u32 1.1754944e-38, %v207_v62  ;;  %vm206_vm14 = vcmp.eq.f32.partialorder %v205_v2, 8.507059e+37  ;;  %v211_v15 = vmul.f32 1.8462286, %v179_v10 }
  0xe3   :  { %v184_v49 = vmul.f32 %v478_v43, %v183_v47 }
  0xe4   :  { %v144_v52 = vpop.f32.mrf.mxu3  ;;  %v214_v18 = vmul.f32 %v211_v15, %v141_v40 }
  0xe5   :  { %v185_v53 = vadd.f32 %v478_v43, %v184_v49 }
  0xe6   :  { %v480_v51 = vpop.eup %479 }
  0xe7   :  { %v197_v54 = vmul.f32 %v480_v51, %v165_v44  ;;  %v189_v0 = vsel %vm616_vm7, %v478_v43, %v185_v53  ;;  %vm202_vm8 = vweird.f32 %v480_v51 }
  0xe8   :  { %v194_v7 = vsel %vm191_vm10, %v193_v3, %v189_v0  ;;  %vm203_vm12 = vmor %vm201_vm11, %vm202_vm8 }
  0xe9   :  { %v198_v58 = vsub.f32 1.0, %v197_v54  ;;  %v212_v13 = vmul.f32 1.8462286, %v194_v7 }
  0xeb   :  { %v199_v1 = vmul.f32 %v480_v51, %v198_v58  ;;  %v215_v17 = vmul.f32 %v212_v13, %v144_v52 }
  0xec   :  { %v147_v11 = vpop.f32.mrf.mxu3 }
  0xed   :  { %v200_v5 = vadd.f32 %v480_v51, %v199_v1 }
  0xef   :  { %v204_v9 = vsel %vm203_vm12, %v480_v51, %v200_v5 }
  0xf0   :  { %v209_v12 = vsel %vm206_vm14, %v208_v8, %v204_v9 }
  0xf1   :  { %v213_v14 = vmul.f32 1.8462286, %v209_v12 }
  0xf3   :  { %v216_v16 = vmul.f32 %v213_v14, %v147_v11 }
  0xf5   :  { %243 = vmatpush.msra.mxu1 %v216_v16 }
  0xf7   :  { %244 = vmatpush.msra.mxu1 %v215_v17 }
  0xf9   :  { %245 = vmatpush.msra.mxu1 %v214_v18 }
  0xfa   :  { %444 = vmatmul.msk.f32.vlgmr.msra.gmra.mxu1 %vm217_vm15, %v38_v19 }
 0x102   :  { %445 = vmatmul.msk.f32.gmra.mxu1 %vm217_vm15, %v39_v20 }
 0x10a   :  { %446 = vmatmul.msk.f32.gmra.mxu1 %vm217_vm15, %v40_v21 }
 0x112   :  { %447 = vmatmul.msk.f32.gmra.mxu1 %vm217_vm15, %v41_v22 }
 0x148   :  { %v289_v23 = vpop.f32.mrf.mxu2 }
 0x150   :  { %v292_v26 = vpop.f32.mrf.mxu2 }
 0x158   :  { %v295_v29 = vpop.f32.mrf.mxu2 }
 0x160   :  { %v298_v32 = vpop.f32.mrf.mxu2 }
 0x177   :  { %v247_v24 = vpop.f32.mrf.mxu1 }
 0x178   :  { %v290_v25 = vadd.f32 %v289_v23, %v247_v24 }
 0x17a   :  { %301 = vxpose.xlu0.b32.start [1/4] (short) %v290_v25, 128 }
 0x17f   :  { %v250_v27 = vpop.f32.mrf.mxu1 }
 0x180   :  { %v293_v28 = vadd.f32 %v292_v26, %v250_v27 }
 0x182   :  { %302 = vxpose.xlu0.b32.cont [2/4] (short) %v293_v28, 128 }
 0x187   :  { %v253_v30 = vpop.f32.mrf.mxu1 }
 0x188   :  { %v296_v31 = vadd.f32 %v295_v29, %v253_v30 }
 0x18a   :  { %303 = vxpose.xlu0.b32.cont [3/4] (short) %v296_v31, 128 }
 0x18f   :  { %v256_v33 = vpop.f32.mrf.mxu1 }
 0x190   :  { %v299_v34 = vadd.f32 %v298_v32, %v256_v33 }
 0x192   :  { %304 = vxpose.xlu0.b32.end [4/4] (short) %v299_v34, 128 }
 0x21e   :  { %v317_v35 = vpop.trf.xlu0 }
 0x21f   :  { %333 = vst.msk [vmem:[#allocation2] sm:$0xff] %vm42_vm0, %v317_v35 }
 0x226   :  { %v393_v36 = vld [vmem:[#allocation2] sm:$0xff]  ;;  %v318_v37 = vpop.trf.xlu0 }
 0x227   :  { %394 = vst [vmem:[%s673_s2] sm:$0xff] %v393_v36 }
 0x228   :  { %334 = vst.msk [vmem:[#allocation2 + $0x8] sm:$0xff] %vm42_vm0, %v318_v37 }
 0x22e   :  { %v319_v38 = vpop.trf.xlu0 }
 0x22f   :  { %v395_v39 = vld [vmem:[#allocation2 + $0x8] sm:$0xff]  ;;  %335 = vst.msk [vmem:[#allocation2 + $0x10] sm:$0xff] %vm42_vm0, %v319_v38 }
 0x230   :  { %396 = vst [vmem:[%s673_s2 + $0x8] sm:$0xff] %v395_v39 }
 0x236   :  { %v397_v40 = vld [vmem:[#allocation2 + $0x10] sm:$0xff]  ;;  %v320_v41 = vpop.trf.xlu0 }
 0x237   :  { %398 = vst [vmem:[%s673_s2 + $0x10] sm:$0xff] %v397_v40 }
 0x238   :  { %336 = vst.msk [vmem:[#allocation2 + $0x18] sm:$0xff] %vm42_vm0, %v320_v41 }
 0x23e   :  { %v321_v42 = vpop.trf.xlu0 }
 0x23f   :  { %v399_v43 = vld [vmem:[#allocation2 + $0x18] sm:$0xff]  ;;  %337 = vst.msk [vmem:[#allocation2 + $0x20] sm:$0xff] %vm42_vm0, %v321_v42 }
 0x240   :  { %400 = vst [vmem:[%s673_s2 + $0x18] sm:$0xff] %v399_v43 }
 0x246   :  { %v401_v44 = vld [vmem:[#allocation2 + $0x20] sm:$0xff]  ;;  %v322_v45 = vpop.trf.xlu0 }
 0x247   :  { %402 = vst [vmem:[%s673_s2 + $0x20] sm:$0xff] %v401_v44 }
 0x248   :  { %338 = vst.msk [vmem:[#allocation2 + $0x28] sm:$0xff] %vm42_vm0, %v322_v45 }
 0x24e   :  { %v323_v46 = vpop.trf.xlu0 }
 0x24f   :  { %v403_v47 = vld [vmem:[#allocation2 + $0x28] sm:$0xff]  ;;  %339 = vst.msk [vmem:[#allocation2 + $0x30] sm:$0xff] %vm42_vm0, %v323_v46 }
 0x250   :  { %404 = vst [vmem:[%s673_s2 + $0x28] sm:$0xff] %v403_v47 }
 0x256   :  { %v405_v48 = vld [vmem:[#allocation2 + $0x30] sm:$0xff]  ;;  %v324_v49 = vpop.trf.xlu0 }
 0x257   :  { %406 = vst [vmem:[%s673_s2 + $0x30] sm:$0xff] %v405_v48 }
 0x258   :  { %340 = vst.msk [vmem:[#allocation2 + $0x38] sm:$0xff] %vm42_vm0, %v324_v49 }
 0x25e   :  { %v325_v50 = vpop.trf.xlu0 }
 0x25f   :  { %v407_v51 = vld [vmem:[#allocation2 + $0x38] sm:$0xff] }
 0x260   :  { %408 = vst [vmem:[%s673_s2 + $0x38] sm:$0xff] %v407_v51 }
 0x266   :  { %v326_v52 = vpop.trf.xlu0 }
 0x26e   :  { %v327_v53 = vpop.trf.xlu0 }
 0x276   :  { %v328_v54 = vpop.trf.xlu0 }
 0x27e   :  { %v329_v55 = vpop.trf.xlu0 }
 0x286   :  { %v330_v56 = vpop.trf.xlu0 }
 0x28e   :  { %v331_v57 = vpop.trf.xlu0 }
 0x296   :  { %v332_v58 = vpop.trf.xlu0 }

</bundles_post_ra>
